<compile_context>
chip_gen: v7x
topology: tpu7x:2x2x1
jax: 0.10.0
libtpu: 0.0.40
codegen_flags: <defaults>
</compile_context>

<pallas_src>
import functools

import jax
import jax.numpy as jnp
from jax import lax
from jax.experimental import pallas as pl
from jax.experimental.pallas import tpu as pltpu


def _attention_kernel(x_ref, m_ref,
                      wkv_ref, bkv_ref,
                      wq_ref, bq_ref,
                      wf_ref, bf_ref,
                      out_ref,
                      *, emb_dim, compute_dtype):
    bt, nk, _ = x_ref.shape
    _, nq, _ = m_ref.shape

    # Flatten (batch, seq) so each projection is one large MXU matmul.
    x2 = x_ref[...].reshape(bt * nk, -1).astype(compute_dtype)   # (Bt*Nk, in)
    m2 = m_ref[...].reshape(bt * nq, -1).astype(compute_dtype)   # (Bt*Nq, msg)

    # Fused K/V projection (f32 accumulation), biases in f32.
    kv = jnp.dot(x2, wkv_ref[...], preferred_element_type=jnp.float32) + bkv_ref[...]
    # Query projection; the emb_dim**-0.5 scale is already folded into Wq/bq.
    q = jnp.dot(m2, wq_ref[...], preferred_element_type=jnp.float32) + bq_ref[...]

    keys = kv[:, :emb_dim].reshape(bt, nk, emb_dim)
    values = kv[:, emb_dim:].reshape(bt, nk, emb_dim)
    q3 = q.reshape(bt, nq, emb_dim)

    # Batched q @ k^T contracting the last axes directly (no transpose).
    scores = lax.dot_general(
        q3.astype(compute_dtype), keys.astype(compute_dtype),
        dimension_numbers=(((2,), (2,)), ((0,), (0,))),
        preferred_element_type=jnp.float32)                      # (Bt, Nq, Nk)

    # Numerically stable softmax in f32; reciprocal on the EUP slot.
    s_max = jnp.max(scores, axis=-1, keepdims=True)
    p = jnp.exp(scores - s_max)
    p = p * pl.reciprocal(jnp.sum(p, axis=-1, keepdims=True), approx=True)

    # Weighted sum of values: (Bt, Nq, emb_dim)
    ctx = lax.dot_general(
        p.astype(compute_dtype), values.astype(compute_dtype),
        dimension_numbers=(((2,), (1,)), ((0,), (0,))),
        preferred_element_type=jnp.float32)

    # Final projection, padded to a lane-dense (multiple-of-128) output.
    out = jnp.dot(ctx.reshape(bt * nq, emb_dim).astype(compute_dtype),
                  wf_ref[...], preferred_element_type=jnp.float32) + bf_ref[...]
    out_ref[...] = out.reshape(bt, nq, -1).astype(out_ref.dtype)


def simple_attention_pallas(x, m, params, emb_dim, *,
                            batch_block=None, compute_dtype=jnp.bfloat16):
    B, Nk, input_dim = x.shape
    B2, Nq, msg_dim = m.shape
    assert B == B2

    wk, bk, wq, bq, wv, bv, wf, bf = params

    # Pack the whole batch into one grid step at small shapes (grid=(1,)).
    if batch_block is None:
        batch_block = B
    assert B % batch_block == 0, "batch_block must divide B"
    grid = (B // batch_block,)

    # Fuse K and V projections; fold the attention scale into the Q projection.
    scale = emb_dim ** (-0.5)
    wkv = jnp.concatenate([wk, wv], axis=1).astype(compute_dtype)   # (in, 2E)
    bkv = jnp.concatenate([bk, bv], axis=1)                         # (1, 2E) f32
    wq_s = (wq * scale).astype(compute_dtype)
    bq_s = bq * scale                                               # f32

    # Zero-pad the final projection so the kernel's output last dim is 128-dense.
    out_pad = ((msg_dim + 127) // 128) * 128
    wf_p = jnp.zeros((emb_dim, out_pad), jnp.float32).at[:, :msg_dim].set(wf)
    wf_p = wf_p.astype(compute_dtype)
    bf_p = jnp.zeros((1, out_pad), jnp.float32).at[:, :msg_dim].set(bf)

    kernel = functools.partial(_attention_kernel,
                               emb_dim=emb_dim, compute_dtype=compute_dtype)

    def full(arr):
        nd = arr.ndim
        return pl.BlockSpec(arr.shape, lambda b, _nd=nd: (0,) * _nd)

    out = pl.pallas_call(
        kernel,
        out_shape=jax.ShapeDtypeStruct((B, Nq, out_pad), jnp.float32),
        grid=grid,
        in_specs=[
            pl.BlockSpec((batch_block, Nk, input_dim), lambda b: (b, 0, 0)),  # x
            pl.BlockSpec((batch_block, Nq, msg_dim), lambda b: (b, 0, 0)),    # m
            full(wkv), full(bkv),
            full(wq_s), full(bq_s),
            full(wf_p), full(bf_p),
        ],
        out_specs=pl.BlockSpec((batch_block, Nq, out_pad), lambda b: (b, 0, 0)),
        compiler_params=pltpu.CompilerParams(
            dimension_semantics=("parallel",)),
    )(x, m, wkv, bkv, wq_s, bq_s, wf_p, bf_p)

    # Drop the lane padding outside the kernel (cheap XLA slice).
    return out[..., :msg_dim]


def simple_attention_ref(x, m, params, emb_dim):
    wk, bk, wq, bq, wv, bv, wf, bf = params
    keys = x @ wk + bk
    queries = m @ wq + bq
    values = x @ wv + bv
    scale = emb_dim ** (-0.25)
    queries = queries * scale
    keys = keys * scale
    dot = jnp.einsum("bqe,bke->bqk", queries, keys)
    dot = jax.nn.softmax(dot, axis=-1)
    out = jnp.einsum("bqk,bke->bqe", dot, values)
    return out @ wf + bf


def init_params(key, input_dim, emb_dim, msg_dim):
    # Deterministic synthetic init (roughly matching nn.Linear scale).
    ks = jax.random.split(key, 8)

    def linear(kw, kb, fan_in, fan_out):
        bound = 1.0 / (fan_in ** 0.5)
        w = jax.random.uniform(kw, (fan_in, fan_out), jnp.float32, -bound, bound)
        b = jax.random.uniform(kb, (1, fan_out), jnp.float32, -bound, bound)
        return w, b

    wk, bk = linear(ks[0], ks[1], input_dim, emb_dim)   # w_keys
    wq, bq = linear(ks[2], ks[3], msg_dim, emb_dim)     # w_queries
    wv, bv = linear(ks[4], ks[5], input_dim, emb_dim)   # w_values
    wf, bf = linear(ks[6], ks[7], emb_dim, msg_dim)     # fc_f
    return (wk, bk, wq, bq, wv, bv, wf, bf)


if __name__ == "__main__":
    B, Nk, Nq = 2, 16, 8
    input_dim, emb_dim, msg_dim = 32, 32, 16

    key = jax.random.PRNGKey(0)
    kx, km, kp = jax.random.split(key, 3)

    x = jax.random.normal(kx, (B, Nk, input_dim), jnp.float32)
    m = jax.random.normal(km, (B, Nq, msg_dim), jnp.float32)
    params = init_params(kp, input_dim, emb_dim, msg_dim)

    ref = simple_attention_ref(x, m, params, emb_dim)

    # f32 MXU path: tight check (approx reciprocal adds ~1e-4-level error).
    out_f32 = simple_attention_pallas(x, m, params, emb_dim,
                                      compute_dtype=jnp.float32)
    out_f32 = jax.block_until_ready(out_f32)
    assert out_f32.shape == (B, Nq, msg_dim)
    assert jnp.allclose(out_f32, ref, atol=1e-3, rtol=1e-3), "f32 path mismatch"

    # bf16 MXU path (production config): relaxed tolerance for bf16 inputs.
    out_bf16 = simple_attention_pallas(x, m, params, emb_dim,
                                       compute_dtype=jnp.bfloat16)
    out_bf16 = jax.block_until_ready(out_bf16)
    assert out_bf16.shape == (B, Nq, msg_dim)
    assert jnp.allclose(out_bf16, ref, atol=2e-2, rtol=2e-2), "bf16 path mismatch"

    print("KERNEL_OK")
</pallas_src>

<mosaic_0001>
module attributes {stable_mosaic.version = 11 : i64} {
  func.func @_attention_kernel(%arg0: i32, %arg1: memref<2x16x32xf32, #tpu.memory_space<vmem>>, %arg2: memref<2x8x16xf32, #tpu.memory_space<vmem>>, %arg3: memref<32x64xf32, #tpu.memory_space<vmem>>, %arg4: memref<1x64xf32, #tpu.memory_space<vmem>>, %arg5: memref<16x32xf32, #tpu.memory_space<vmem>>, %arg6: memref<1x32xf32, #tpu.memory_space<vmem>>, %arg7: memref<32x128xf32, #tpu.memory_space<vmem>>, %arg8: memref<1x128xf32, #tpu.memory_space<vmem>>, %arg9: memref<2x8x128xf32, #tpu.memory_space<vmem>>) attributes {dimension_semantics = [#tpu.dimension_semantics<parallel>], iteration_bounds = array<i64: 1>, scalar_prefetch = 0 : i64, scratch_operands = 0 : i64, tpu.core_type = #tpu.core_type<tc>, window_params = [{transform_indices = @transform_0, window_bounds = array<i64: 2, 16, 32>}, {transform_indices = @transform_1, window_bounds = array<i64: 2, 8, 16>}, {pipeline_mode = #tpu.pipeline_mode<synchronous>, transform_indices = @transform_2, window_bounds = array<i64: 32, 64>}, {pipeline_mode = #tpu.pipeline_mode<synchronous>, transform_indices = @transform_3, window_bounds = array<i64: 1, 64>}, {pipeline_mode = #tpu.pipeline_mode<synchronous>, transform_indices = @transform_4, window_bounds = array<i64: 16, 32>}, {pipeline_mode = #tpu.pipeline_mode<synchronous>, transform_indices = @transform_5, window_bounds = array<i64: 1, 32>}, {pipeline_mode = #tpu.pipeline_mode<synchronous>, transform_indices = @transform_6, window_bounds = array<i64: 32, 128>}, {pipeline_mode = #tpu.pipeline_mode<synchronous>, transform_indices = @transform_7, window_bounds = array<i64: 1, 128>}, {transform_indices = @transform_8, window_bounds = array<i64: 2, 8, 128>}]} {
    %c0 = arith.constant 0 : index
    %c0_0 = arith.constant 0 : index
    %c0_1 = arith.constant 0 : index
    %0 = vector.load %arg1[%c0, %c0_0, %c0_1] : memref<2x16x32xf32, #tpu.memory_space<vmem>>, vector<2x16x32xf32>
    %1 = vector.shape_cast %0 : vector<2x16x32xf32> to vector<32x32xf32>
    %c0_2 = arith.constant 0 : index
    %c0_3 = arith.constant 0 : index
    %c0_4 = arith.constant 0 : index
    %2 = vector.load %arg2[%c0_2, %c0_3, %c0_4] : memref<2x8x16xf32, #tpu.memory_space<vmem>>, vector<2x8x16xf32>
    %3 = vector.shape_cast %2 : vector<2x8x16xf32> to vector<16x16xf32>
    %c0_5 = arith.constant 0 : index
    %c0_6 = arith.constant 0 : index
    %4 = vector.load %arg3[%c0_5, %c0_6] : memref<32x64xf32, #tpu.memory_space<vmem>>, vector<32x64xf32>
    %cst = arith.constant dense<0.000000e+00> : vector<32x64xf32>
    %5 = tpu.matmul %1, %4, %cst {dimension_numbers = #tpu.dot_dimension_numbers<[1], [0], [0], [1], [0, 0, 1, 1], [], []>} : vector<32x32xf32>, vector<32x64xf32>, vector<32x64xf32> -> vector<32x64xf32>
    %c0_7 = arith.constant 0 : index
    %c0_8 = arith.constant 0 : index
    %6 = vector.load %arg4[%c0_7, %c0_8] : memref<1x64xf32, #tpu.memory_space<vmem>>, vector<1x64xf32>
    %7 = vector.broadcast %6 : vector<1x64xf32> to vector<32x64xf32>
    %8 = arith.addf %5, %7 : vector<32x64xf32>
    %c0_9 = arith.constant 0 : index
    %c0_10 = arith.constant 0 : index
    %9 = vector.load %arg5[%c0_9, %c0_10] : memref<16x32xf32, #tpu.memory_space<vmem>>, vector<16x32xf32>
    %cst_11 = arith.constant dense<0.000000e+00> : vector<16x32xf32>
    %10 = tpu.matmul %3, %9, %cst_11 {dimension_numbers = #tpu.dot_dimension_numbers<[1], [0], [0], [1], [0, 0, 1, 1], [], []>} : vector<16x16xf32>, vector<16x32xf32>, vector<16x32xf32> -> vector<16x32xf32>
    %c0_12 = arith.constant 0 : index
    %c0_13 = arith.constant 0 : index
    %11 = vector.load %arg6[%c0_12, %c0_13] : memref<1x32xf32, #tpu.memory_space<vmem>>, vector<1x32xf32>
    %12 = vector.broadcast %11 : vector<1x32xf32> to vector<16x32xf32>
    %13 = arith.addf %10, %12 : vector<16x32xf32>
    %14 = vector.extract_strided_slice %8 {offsets = [0, 0], sizes = [32, 32], strides = [1, 1]} : vector<32x64xf32> to vector<32x32xf32>
    %15 = vector.shape_cast %14 : vector<32x32xf32> to vector<2x16x32xf32>
    %16 = vector.extract_strided_slice %8 {offsets = [0, 32], sizes = [32, 32], strides = [1, 1]} : vector<32x64xf32> to vector<32x32xf32>
    %17 = vector.shape_cast %16 : vector<32x32xf32> to vector<2x16x32xf32>
    %18 = vector.shape_cast %13 : vector<16x32xf32> to vector<2x8x32xf32>
    %cst_14 = arith.constant dense<0.000000e+00> : vector<2x8x16xf32>
    %19 = tpu.matmul %18, %15, %cst_14 {dimension_numbers = #tpu.dot_dimension_numbers<[2], [2], [1], [1], [0, 0, 0, 1, 1, 1], [0], [0]>} : vector<2x8x32xf32>, vector<2x16x32xf32>, vector<2x8x16xf32> -> vector<2x8x16xf32>
    %cst_15 = arith.constant dense<0xFF800000> : vector<2x8xf32>
    %20 = vector.multi_reduction <maximumf>, %19, %cst_15 [2] : vector<2x8x16xf32> to vector<2x8xf32>
    %21 = vector.shape_cast %20 : vector<2x8xf32> to vector<2x8x1xf32>
    %22 = vector.broadcast %21 : vector<2x8x1xf32> to vector<2x8x16xf32>
    %23 = arith.subf %19, %22 : vector<2x8x16xf32>
    %24 = math.exp %23 : vector<2x8x16xf32>
    %cst_16 = arith.constant dense<0.000000e+00> : vector<2x8xf32>
    %25 = vector.multi_reduction <add>, %24, %cst_16 [2] : vector<2x8x16xf32> to vector<2x8xf32>
    %26 = vector.shape_cast %25 : vector<2x8xf32> to vector<2x8x1xf32>
    %27 = tpu.reciprocal %26 {approx = true} : vector<2x8x1xf32> -> vector<2x8x1xf32>
    %28 = vector.broadcast %27 : vector<2x8x1xf32> to vector<2x8x16xf32>
    %29 = arith.mulf %24, %28 : vector<2x8x16xf32>
    %cst_17 = arith.constant dense<0.000000e+00> : vector<2x8x32xf32>
    %30 = tpu.matmul %29, %17, %cst_17 {dimension_numbers = #tpu.dot_dimension_numbers<[2], [1], [1], [2], [0, 0, 0, 1, 1, 2], [0], [0]>} : vector<2x8x16xf32>, vector<2x16x32xf32>, vector<2x8x32xf32> -> vector<2x8x32xf32>
    %31 = vector.shape_cast %30 : vector<2x8x32xf32> to vector<16x32xf32>
    %c0_18 = arith.constant 0 : index
    %c0_19 = arith.constant 0 : index
    %32 = vector.load %arg7[%c0_18, %c0_19] : memref<32x128xf32, #tpu.memory_space<vmem>>, vector<32x128xf32>
    %cst_20 = arith.constant dense<0.000000e+00> : vector<16x128xf32>
    %33 = tpu.matmul %31, %32, %cst_20 {dimension_numbers = #tpu.dot_dimension_numbers<[1], [0], [0], [1], [0, 0, 1, 1], [], []>} : vector<16x32xf32>, vector<32x128xf32>, vector<16x128xf32> -> vector<16x128xf32>
    %c0_21 = arith.constant 0 : index
    %c0_22 = arith.constant 0 : index
    %34 = vector.load %arg8[%c0_21, %c0_22] : memref<1x128xf32, #tpu.memory_space<vmem>>, vector<1x128xf32>
    %35 = vector.broadcast %34 : vector<1x128xf32> to vector<16x128xf32>
    %36 = arith.addf %33, %35 : vector<16x128xf32>
    %37 = vector.shape_cast %36 : vector<16x128xf32> to vector<2x8x128xf32>
    %c0_23 = arith.constant 0 : index
    %c0_24 = arith.constant 0 : index
    %c0_25 = arith.constant 0 : index
    %38 = vector.load %arg9[%c0_23, %c0_24, %c0_25] : memref<2x8x128xf32, #tpu.memory_space<vmem>>, vector<2x8x128xf32>
    tpu.vector_store %arg9[%c0_23, %c0_24, %c0_25], %37 {strides = array<i32>} : memref<2x8x128xf32, #tpu.memory_space<vmem>>, vector<2x8x128xf32>,
    return
  }
  func.func @transform_0(%arg0: i32) -> (i32, i32, i32) {
    %c0_i32 = arith.constant 0 : i32
    %c0_i32_0 = arith.constant 0 : i32
    %c0_i32_1 = arith.constant 0 : i32
    return %arg0, %c0_i32, %c0_i32_0 : i32, i32, i32
  }
  func.func @transform_1(%arg0: i32) -> (i32, i32, i32) {
    %c0_i32 = arith.constant 0 : i32
    %c0_i32_0 = arith.constant 0 : i32
    %c0_i32_1 = arith.constant 0 : i32
    return %arg0, %c0_i32, %c0_i32_0 : i32, i32, i32
  }
  func.func @transform_2(%arg0: i32) -> (i32, i32) {
    %c0_i32 = arith.constant 0 : i32
    %c0_i32_0 = arith.constant 0 : i32
    %c0_i32_1 = arith.constant 0 : i32
    return %c0_i32, %c0_i32_0 : i32, i32
  }
  func.func @transform_3(%arg0: i32) -> (i32, i32) {
    %c0_i32 = arith.constant 0 : i32
    %c0_i32_0 = arith.constant 0 : i32
    %c0_i32_1 = arith.constant 0 : i32
    return %c0_i32, %c0_i32_0 : i32, i32
  }
  func.func @transform_4(%arg0: i32) -> (i32, i32) {
    %c0_i32 = arith.constant 0 : i32
    %c0_i32_0 = arith.constant 0 : i32
    %c0_i32_1 = arith.constant 0 : i32
    return %c0_i32, %c0_i32_0 : i32, i32
  }
  func.func @transform_5(%arg0: i32) -> (i32, i32) {
    %c0_i32 = arith.constant 0 : i32
    %c0_i32_0 = arith.constant 0 : i32
    %c0_i32_1 = arith.constant 0 : i32
    return %c0_i32, %c0_i32_0 : i32, i32
  }
  func.func @transform_6(%arg0: i32) -> (i32, i32) {
    %c0_i32 = arith.constant 0 : i32
    %c0_i32_0 = arith.constant 0 : i32
    %c0_i32_1 = arith.constant 0 : i32
    return %c0_i32, %c0_i32_0 : i32, i32
  }
  func.func @transform_7(%arg0: i32) -> (i32, i32) {
    %c0_i32 = arith.constant 0 : i32
    %c0_i32_0 = arith.constant 0 : i32
    %c0_i32_1 = arith.constant 0 : i32
    return %c0_i32, %c0_i32_0 : i32, i32
  }
  func.func @transform_8(%arg0: i32) -> (i32, i32, i32) {
    %c0_i32 = arith.constant 0 : i32
    %c0_i32_0 = arith.constant 0 : i32
    %c0_i32_1 = arith.constant 0 : i32
    return %arg0, %c0_i32, %c0_i32_0 : i32, i32, i32
  }
}

</mosaic_0001>

<bundles_post_ra>
// kernel: tpu_custom_call.1
= control target key start
LH: loop header
LB: loop body
LE: loop exit
PB: predicated region body
PF: predicated region fallthrough
CT: control target
= control target key end

     0   :  { %13 = vsyncpa [#allocation3], 0  ;;  %s1260_s0 = inlined_call_operand.hbm [shape: f32[2,16,32], index: 0, kind: input, shape index: {}]   ;;  %s1261_s1 = inlined_call_operand.hbm [shape: f32[2,8,16], index: 1, kind: input, shape index: {}]   ;;  %s1262_s2 = inlined_call_operand.hbm [shape: f32[32,64], index: 2, kind: input, shape index: {}]   ;;  %s1263_s3 = inlined_call_operand.vmem [shape: f32[1,64], index: 3, kind: input, shape index: {}]   ;;  %s1264_s4 = inlined_call_operand.hbm [shape: f32[16,32], index: 4, kind: input, shape index: {}]   ;;  %s1265_s5 = inlined_call_operand.vmem [shape: f32[1,32], index: 5, kind: input, shape index: {}]   ;;  %s1266_s6 = inlined_call_operand.hbm [shape: f32[32,128], index: 6, kind: input, shape index: {}]   ;;  %s1267_s7 = inlined_call_operand.vmem [shape: f32[1,128], index: 7, kind: input, shape index: {}]   ;;  %s1268_s8 = inlined_call_operand.hbm [shape: f32[2,8,128], index: 8, kind: output, shape index: {}]  }
   0x1   :  { %14 = vsyncpa [#allocation6], 0 }
   0x2   :  { %15 = vsyncpa [#allocation9], 0 }
   0x3   :  { %16 = vsyncpa [#allocation4], 0  ;;  %s1068_s27 = smov [#allocation5]   ;;  %s1069_s29 = smov [#allocation8]  }
   0x4   :  { %s34_s28 = sshll.u32 %s1068_s27, 4  ;;  %s60_s30 = sshll.u32 %s1069_s29, 4  ;;  %s35_s28 = int_to_ptr.vmem [resolvable:$true] %s34_s28  ;;  %s1125_s30 = int_to_ptr.vmem [resolvable:$true] %s60_s30 }
   0x5   :  { %s928_s11 = scalar_lea.hbm %s1261_s1, 256 }
   0x6   :  { %p929_p0 = scmp.ne.s32.totalorder %s1261_s1, %s928_s11  ;;  %p932_p1 = scmp.lt.u32.totalorder %s928_s11, %s1261_s1 }
   0x8   :  { %p934_p2 = pnand %p932_p1, %p929_p0 }
   0xa   :  { %937 = shalt.err (!%p934_p2)
}
   0xb   :  { %s938_s16 = scalar_lea.vmem %s35_s28, 256  ;;  %p943_p4 = scmp.lt.s32.totalorder %s35_s28, %s35_s28 }
   0xc   :  { %p939_p3 = scmp.ne.s32.totalorder %s35_s28, %s938_s16  ;;  %p944_p5 = scmp.lt.s32.totalorder %s938_s16, %s938_s16 }
   0xe   :  { %p945_p6 = por %p944_p5, %p943_p4 }
  0x10   :  { %p946_p7 = pnand %p945_p6, %p939_p3 }
  0x12   :  { %949 = shalt.err (!%p946_p7)
}
  0x13   :  { %s1070_s17 = smov 128   ;;  %s1071_s18 = smov 8  }
  0x14   :  { %40 = dma.hbm_to_vmem [thread:$0]  %s1261_s1, 256, %s35_s28, [#allocation6], %s1070_s17, %s1070_s17, %s1071_s18  }
  0x15   :  { %s950_s23 = scalar_lea.hbm %s1264_s4, 256 }
  0x16   :  { %p951_p8 = scmp.ne.s32.totalorder %s1264_s4, %s950_s23  ;;  %p954_p9 = scmp.lt.u32.totalorder %s950_s23, %s1264_s4 }
  0x18   :  { %p956_p10 = pnand %p954_p9, %p951_p8 }
  0x1a   :  { %959 = shalt.err (!%p956_p10)
}
  0x1b   :  { %s960_s29 = scalar_lea.vmem %s1125_s30, 256  ;;  %p965_p12 = scmp.lt.s32.totalorder %s1125_s30, %s1125_s30 }
  0x1c   :  { %p961_p11 = scmp.ne.s32.totalorder %s1125_s30, %s960_s29  ;;  %p966_p13 = scmp.lt.s32.totalorder %s960_s29, %s960_s29 }
  0x1e   :  { %p967_p0 = por %p966_p13, %p965_p12 }
  0x20   :  { %p968_p1 = pnand %p967_p0, %p961_p11 }
  0x22   :  { %971 = shalt.err (!%p968_p1)
}
  0x23   :  { %66 = dma.hbm_to_vmem [thread:$0]  %s1264_s4, 256, %s1125_s30, [#allocation9], %s1070_s17, %s1070_s17, %s1071_s18  }
  0x24   :  { %s1072_s9 = smov [#allocation2]   ;;  %s1073_s11 = smov [#allocation7]  }
  0x25   :  { %s22_s10 = sshll.u32 %s1072_s9, 4  ;;  %s46_s12 = sshll.u32 %s1073_s11, 4  ;;  %s23_s10 = int_to_ptr.vmem [resolvable:$true] %s22_s10  ;;  %s1162_s12 = int_to_ptr.vmem [resolvable:$true] %s46_s12 }
  0x26   :  { %s972_s15 = scalar_lea.hbm %s1260_s0, 512 }
  0x27   :  { %p973_p2 = scmp.ne.s32.totalorder %s1260_s0, %s972_s15  ;;  %p976_p3 = scmp.lt.u32.totalorder %s972_s15, %s1260_s0 }
  0x29   :  { %p978_p4 = pnand %p976_p3, %p973_p2 }
  0x2b   :  { %981 = shalt.err (!%p978_p4)
}
  0x2c   :  { %s982_s4 = scalar_lea.vmem %s23_s10, 512  ;;  %p987_p6 = scmp.lt.s32.totalorder %s23_s10, %s23_s10 }
  0x2d   :  { %p983_p5 = scmp.ne.s32.totalorder %s23_s10, %s982_s4  ;;  %p988_p7 = scmp.lt.s32.totalorder %s982_s4, %s982_s4 }
  0x2f   :  { %p989_p8 = por %p988_p7, %p987_p6 }
  0x31   :  { %p990_p9 = pnand %p989_p8, %p983_p5 }
  0x33   :  { %993 = shalt.err (!%p990_p9)
}
  0x34   :  { %28 = dma.hbm_to_vmem [thread:$0]  %s1260_s0, 512, %s23_s10, [#allocation3], %s1070_s17, %s1070_s17, %s1071_s18  }
  0x35   :  { %s994_s25 = scalar_lea.hbm %s1262_s2, 512 }
  0x36   :  { %p995_p10 = scmp.ne.s32.totalorder %s1262_s2, %s994_s25  ;;  %p998_p11 = scmp.lt.u32.totalorder %s994_s25, %s1262_s2 }
  0x38   :  { %p1000_p12 = pnand %p998_p11, %p995_p10 }
  0x3a   :  { %1003 = shalt.err (!%p1000_p12)
}
  0x3b   :  { %s1004_s28 = scalar_lea.vmem %s1162_s12, 512  ;;  %p1009_p0 = scmp.lt.s32.totalorder %s1162_s12, %s1162_s12 }
  0x3c   :  { %p1005_p13 = scmp.ne.s32.totalorder %s1162_s12, %s1004_s28  ;;  %p1010_p1 = scmp.lt.s32.totalorder %s1004_s28, %s1004_s28 }
  0x3e   :  { %p1011_p2 = por %p1010_p1, %p1009_p0 }
  0x40   :  { %p1012_p3 = pnand %p1011_p2, %p1005_p13 }
  0x42   :  { %1015 = shalt.err (!%p1012_p3)
}
  0x43   :  { %52 = dma.hbm_to_vmem [thread:$0]  %s1262_s2, 512, %s1162_s12, [#allocation6], %s1070_s17, %s1070_s17, %s1071_s18  }
  0x44   :  { %s1074_s10 = smov [#allocation10]   ;;  %s1016_s15 = scalar_lea.hbm %s1266_s6, 512 }
  0x45   :  { %s74_s11 = sshll.u32 %s1074_s10, 4  ;;  %p1017_p4 = scmp.ne.s32.totalorder %s1266_s6, %s1016_s15  ;;  %s75_s11 = int_to_ptr.vmem [resolvable:$true] %s74_s11 }
  0x46   :  { %p1020_p5 = scmp.lt.u32.totalorder %s1016_s15, %s1266_s6 }
  0x48   :  { %p1022_p6 = pnand %p1020_p5, %p1017_p4 }
  0x4a   :  { %1025 = shalt.err (!%p1022_p6)
}
  0x4b   :  { %s1026_s4 = scalar_lea.vmem %s75_s11, 512  ;;  %p1031_p8 = scmp.lt.s32.totalorder %s75_s11, %s75_s11 }
  0x4c   :  { %p1027_p7 = scmp.ne.s32.totalorder %s75_s11, %s1026_s4  ;;  %p1032_p9 = scmp.lt.s32.totalorder %s1026_s4, %s1026_s4 }
  0x4e   :  { %p1033_p10 = por %p1032_p9, %p1031_p8 }
  0x50   :  { %p1034_p11 = pnand %p1033_p10, %p1027_p7 }
  0x52   :  { %1037 = shalt.err (!%p1034_p11)
}
  0x53   :  { %80 = dma.hbm_to_vmem [thread:$0]  %s1266_s6, 512, %s75_s11, [#allocation9], %s1070_s17, %s1070_s17, %s1071_s18  }
  0x54   :  { %1060 = dma.done.wait [#allocation3], 512  }
  0x55   :  { %1061 = vsyncadd [#allocation3], 4294966784 }
  0x56   :  { %1062 = dma.done.wait [#allocation6], 768  }
  0x57   :  { %1063 = vsyncadd [#allocation6], 4294966528 }
  0x58   :  { %1064 = dma.done.wait [#allocation9], 768  }
  0x59   :  { %1065 = vsyncadd [#allocation9], 4294966528  ;;  %vm115_vm0 = vcmask 261120   ;;  %v104_v0 = vld [vmem:[#allocation7] sm:$0xff]  ;;  %v105_v1 = vld [vmem:[#allocation7 + $0x8] sm:$0xff]  ;;  %vm222_vm1 = vcmask 130048  }
  0x5a   :  { %v106_v2 = vld [vmem:[#allocation7 + $0x10] sm:$0xff]  ;;  %v864_v3 = vpack.c.bf16 %v105_v1, %v104_v0  ;;  %v107_v4 = vld [vmem:[#allocation7 + $0x18] sm:$0xff]  ;;  %v213_v7 = vld [vmem:[#allocation8] sm:$0xff]  ;;  %v1075_v15 = vmov 0.0|0.0   ;;  %vm1076_vm2 = vmmov 0   ;;  %v1077_v16 = vmov 0.0  }
  0x5b   :  { %v98_v5 = vld [vmem:[#allocation2] sm:$0xff]  ;;  %v868_v6 = vpack.c.bf16 %v107_v4, %v106_v2  ;;  %v214_v8 = vld [vmem:[#allocation8 + $0x8] sm:$0xff]  ;;  %v103_v11 = vld [vmem:[#allocation5 + $0x8] sm:$0xff]  ;;  %s1079_s25 = smov [#allocation11]  }
  0x5c   :  { %812 = vmatprep.mubr.msk.f32.mxu0 %vm115_vm0, %v98_v5  ;;  %865 = vmatprep.subr.bf16.mxu0 %v864_v3  ;;  %v102_v9 = vld [vmem:[#allocation5] sm:$0xff]  ;;  %v872_v10 = vpack.c.bf16 %v214_v8, %v213_v7  ;;  %v99_v12 = vld [vmem:[#allocation2 + $0x8] sm:$0xff]  ;;  %v100_v13 = vld [vmem:[#allocation2 + $0x10] sm:$0xff]  ;;  %s741_s26 = sshll.u32 %s1079_s25, 4  ;;  %s742_s26 = int_to_ptr.vmem [resolvable:$true] %s741_s26 }
  0x5d   :  { %867 = vmatpush3.bf16.msra.mxu0 %v864_v3  ;;  %822 = vmatprep.mubr.msk.f32.mxu1 %vm222_vm1, %v102_v9  ;;  %v101_v14 = vld [vmem:[#allocation2 + $0x18] sm:$0xff]  ;;  %v755_v17 = vld [vmem:[%s1263_s3] ss:$0 sm:$0xff]  ;;  %vm878_vm3 = vmpackc.low %vm115_vm0, %vm115_vm0  ;;  %s1078_s3 = smov 96   ;;  %s1038_s27 = scalar_lea.vmem %s742_s26, 256 }
  0x5e   :  { %869 = vmatprep.subr.bf16.mxu0 %v868_v6  ;;  %873 = vmatprep.subr.bf16.mxu1 %v872_v10  ;;  %v760_v30 = vld [vmem:[%s1265_s5] ss:$0 sm:$0xff]  ;;  %v643_v56 = vld [vmem:[#allocation10 + $0x8] sm:$0xff]  ;;  %v644_v4 = vld [vmem:[#allocation10 + $0x10] sm:$0xff]  ;;  %p1039_p12 = scmp.ne.s32.totalorder %s742_s26, %s1038_s27  ;;  %p1043_p13 = scmp.lt.s32.totalorder %s742_s26, %s742_s26 }
  0x5f   :  { %875 = vmatpush3.bf16.msra.mxu1 %v872_v10  ;;  %v642_v55 = vld [vmem:[#allocation10] sm:$0xff]  ;;  %v645_v5 = vld [vmem:[#allocation10 + $0x18] sm:$0xff]  ;;  %p1044_p0 = scmp.lt.s32.totalorder %s1038_s27, %s1038_s27 }
  0x60   :  { %876 = vmatprep.subr.bf16.mxu1 %v1075_v15  ;;  %v890_v57 = vpack.c.bf16 %v643_v56, %v642_v55 }
  0x61   :  { %871 = vmatpush3.bf16.msra.mxu0 %v868_v6  ;;  %v894_v6 = vpack.c.bf16 %v645_v5, %v644_v4  ;;  %p1045_p1 = por %p1044_p0, %p1043_p13 }
  0x62   :  { %823 = vmatmul.mubr.msk.f32.vlgmr.msra.gmra.mrb[0].mxu1 %vm222_vm1, %v103_v11  ;;  %880 = vmatprep.subr.bf16.mxu0 %v1075_v15  ;;  %v771_v11 = vld [vmem:[%s1267_s7] ss:$0 sm:$0xff] }
  0x63   :  { %829 = vmatprep.mubr.msk.f32.mxu1 %vm1076_vm2, %v1077_v16  ;;  %p1046_p2 = pnand %p1045_p1, %p1039_p12 }
  0x64   :  { %813 = vmatmul.mubr.msk.f32.vlgmr.msra.gmra.mrb[0].mxu0 %vm115_vm0, %v99_v12 }
  0x65   :  { %815 = vmatprep.mubr.msk.f32.mxu0 %vm115_vm0, %v100_v13 }
  0x68   :  { %816 = vmatmul.mubr.msk.f32.gmra.mrb[2].mxu0 %vm115_vm0, %v101_v14 }
  0x69   :  { %836 = vmatprep.mubr.msk.f32.mxu0 %vm1076_vm2, %v1077_v16 }
 0x135   :  { %v824_v18 = vpop.f32.mrb[0].mxu1 }
 0x136   :  { %v295_v20 = vpop.f32.mrb[1].mxu1  ;;  %v301_v34 = vadd.f32 %v824_v18, %v760_v30 }
 0x137   :  { %v814_v19 = vpop.f32.mrb[0].mxu0  ;;  %v296_v33 = vadd.f32 %v760_v30, %v295_v20 }
 0x138   :  { %v200_v21 = vadd.f32 %v814_v19, %v755_v17  ;;  %v194_v22 = vpop.f32.mrb[1].mxu0 }
 0x139   :  { %v195_v23 = vadd.f32 %v755_v17, %v194_v22 }
 0x13b   :  { %v910_v24 = vpack.i.bf16 %v200_v21, %v195_v23  ;;  %v877_v25 = vpack.c.bf16 %v200_v21, %v195_v23  ;;  %v817_v26 = vpop.f32.mrb[2].mxu0 }
 0x13c   :  { %v210_v27 = vadd.f32 %v817_v26, %v755_v17  ;;  %v204_v28 = vpop.f32.mrb[3].mxu0 }
 0x13d   :  { %v205_v29 = vadd.f32 %v755_v17, %v204_v28  ;;  %879 = vmatpush3.bf16.xpose.msk.msra.mxu1 %vm878_vm3, %v877_v25 }
 0x13e   :  { %884 = vmatprep.subr.bf16.mxu1 %v1075_v15 }
 0x13f   :  { %v915_v31 = vpack.i.bf16 %v210_v27, %v205_v29  ;;  %v881_v32 = vpack.c.bf16 %v210_v27, %v205_v29 }
 0x141   :  { %883 = vmatpush3.bf16.xpose.msk.msra.mxu0 %vm878_vm3, %v881_v32 }
 0x142   :  { %887 = vmatprep.subr.bf16.mxu0 %v1075_v15 }
 0x144   :  { %830 = vmatmul.mubr.msk.f32.vlgmr.msra.gmra.mrb[2].mxu1 %vm115_vm0, %v296_v33 }
 0x145   :  { %843 = vmatprep.mubr.msk.f32.mxu1 %vm1076_vm2, %v1077_v16 }
 0x148   :  { %837 = vmatmul.mubr.msk.f32.vlgmr.msra.gmra.mrb[4].mxu0 %vm115_vm0, %v301_v34 }
 0x149   :  { %850 = vmatprep.mubr.msk.f32.mxu0 %vm1076_vm2, %v1077_v16 }
 0x217   :  { %v379_v35 = vpop.f32.mrb[2].mxu1 }
 0x218   :  { %v831_v36 = vpop.f32.mrb[3].mxu1  ;;  %v462_v37 = vsel %vm222_vm1, %v379_v35, -inf }
 0x219   :  { %463 = vmax.xlane.f32.xlu0 %v462_v37 }
 0x21b   :  { %v458_v38 = vpop.f32.mrb[4].mxu0 }
 0x21c   :  { %v838_v39 = vpop.f32.mrb[5].mxu0  ;;  %v465_v40 = vsel %vm222_vm1, %v458_v38, -inf }
 0x21d   :  { %466 = vmax.xlane.f32.xlu0 %v465_v40 }
 0x233   :  { %911 = vrot.lane.b32.xlu0 %v910_v24, %s1078_s3 }
 0x2a6   :  { %v464_v41 = vpop.xlane.xlu0 %463 }
 0x2a7   :  { %v468_v42 = vsub.f32 %v379_v35, %v464_v41 }
 0x2a9   :  { %v470_v43 = vmul.f32 1.442695, %v468_v42 }
 0x2aa   :  { %v467_v44 = vpop.xlane.xlu0 %466 }
 0x2ab   :  { %920 = vpow2.f32 %v470_v43  ;;  %v469_v45 = vsub.f32 %v458_v38, %v467_v44 }
 0x2ad   :  { %v472_v46 = vmul.f32 1.442695, %v469_v45 }
 0x2ae   :  { %v912_v47 = vpop.permute.xlu0 %911 }
 0x2af   :  { %922 = vpow2.f32 %v472_v46  ;;  %v914_v48 = vunpack.i.h.bf16 %v912_v47  ;;  %v913_v49 = vunpack.i.l.bf16 %v912_v47 }
 0x2b1   :  { %v885_v50 = vpack.c.bf16 %v914_v48, %v913_v49 }
 0x2b3   :  { %886 = vmatpush3.bf16.msra.mxu1 %v885_v50 }
 0x2b4   :  { %891 = vmatprep.subr.bf16.mxu1 %v890_v57 }
 0x2b5   :  { %v921_v51 = vpop.eup %920 }
 0x2b6   :  { %v474_v52 = vsel %vm222_vm1, %v921_v51, 0.0 }
 0x2b7   :  { %475 = vadd.xlane.f32.xlu1 %v474_v52 }
 0x2b9   :  { %v923_v53 = vpop.eup %922 }
 0x2ba   :  { %v477_v54 = vsel %vm222_vm1, %v923_v53, 0.0 }
 0x2bb   :  { %478 = vadd.xlane.f32.xlu1 %v477_v54 }
 0x2cc   :  { %916 = vrot.lane.b32.xlu1 %v915_v31, %s1078_s3 }
 0x344   :  { %v476_v58 = vpop.xlane.xlu1 %475 }
 0x345   :  { %924 = vrcp.f32 %v476_v58 }
 0x348   :  { %v479_v59 = vpop.xlane.xlu1 %478 }
 0x349   :  { %926 = vrcp.f32 %v479_v59 }
 0x34c   :  { %v917_v60 = vpop.permute.xlu1 %916 }
 0x34d   :  { %v919_v61 = vunpack.i.h.bf16 %v917_v60  ;;  %v918_v62 = vunpack.i.l.bf16 %v917_v60 }
 0x34f   :  { %v925_v63 = vpop.eup %924  ;;  %v888_v0 = vpack.c.bf16 %v919_v61, %v918_v62 }
 0x350   :  { %v482_v1 = vmul.f32 %v925_v63, %v921_v51 }
 0x351   :  { %889 = vmatpush3.bf16.msra.mxu0 %v888_v0 }
 0x352   :  { %844 = vmatmul.mubr.msk.f32.vlgmr.msra.gmra.mrb[4].mxu1 %vm222_vm1, %v482_v1 }
 0x353   :  { %v927_v2 = vpop.eup %926  ;;  %893 = vmatpush3.bf16.msra.mxu1 %v890_v57 }
 0x354   :  { %v483_v3 = vmul.f32 %v927_v2, %v923_v53  ;;  %895 = vmatprep.subr.bf16.mxu1 %v894_v6 }
 0x356   :  { %851 = vmatmul.mubr.msk.f32.vlgmr.msra.gmra.mrb[6].mxu0 %vm222_vm1, %v483_v3 }
 0x357   :  { %897 = vmatpush3.bf16.msra.mxu1 %v894_v6 }
 0x425   :  { %v559_v7 = vpop.f32.mrb[4].mxu1 }
 0x426   :  { %v845_v8 = vpop.f32.mrb[5].mxu1  ;;  %861 = vmatprep.mubr.msk.f32.mxu1 %vm115_vm0, %v559_v7 }
 0x429   :  { %v638_v9 = vpop.f32.mrb[6].mxu0 }
 0x42a   :  { %v852_v10 = vpop.f32.mrb[7].mxu0  ;;  %862 = vmatmul.mubr.msk.f32.vlgmr.msra.gmra.mrb[6].mxu1 %vm115_vm0, %v638_v9 }
 0x4fd   :  { %v863_v12 = vpop.f32.mrb[6].mxu1 }
 0x4fe   :  { %v731_v13 = vadd.f32 %v863_v12, %v771_v11  ;;  %v725_v14 = vpop.f32.mrb[7].mxu1 }
 0x4ff   :  { %v726_v15 = vadd.f32 %v771_v11, %v725_v14 }
 0x500   :  { %735 = vst [vmem:[#allocation11 + $0x8] sm:$0xff] %v731_v13 }
 0x501   :  { %734 = vst [vmem:[#allocation11] sm:$0xff] %v726_v15 }
 0x502   :  { %1049 = shalt.err (!%p1046_p2)
}
 0x503   :  { %s1050_s7 = scalar_lea.hbm %s1268_s8, 256 }
 0x504   :  { %p1051_p3 = scmp.ne.s32.totalorder %s1268_s8, %s1050_s7  ;;  %p1054_p4 = scmp.lt.u32.totalorder %s1050_s7, %s1268_s8 }
 0x506   :  { %p1056_p5 = pnand %p1054_p4, %p1051_p3 }
 0x508   :  { %1059 = shalt.err (!%p1056_p5)
}
 0x509   :  { %747 = dma.vmem_to_hbm [thread:$0]  %s742_s26, 256, %s1268_s8, [#allocation4], %s1070_s17, %s1070_s17, %s1071_s18  }
 0x50a   :  { %1066 = dma.done.wait [#allocation4], 256  }
 0x50b   :  { %1067 = vsyncadd [#allocation4], 4294967040 }
 0x50c   :  { %751 = vsyncpa [#allocation3], 1 }
 0x50d   :  { %752 = vsyncpa [#allocation6], 1 }
 0x50e   :  { %753 = vsyncpa [#allocation9], 1 }
 0x50f   :  { %754 = vsyncpa [#allocation4], 1 }

</bundles_post_ra>
